<compile_context>
chip_gen: v7x
topology: tpu7x:2x2x1
jax: 0.10.0
libtpu: 0.0.40
codegen_flags: <defaults>
</compile_context>

<pallas_src>
import jax
import jax.numpy as jnp
from jax.experimental import pallas as pl
from jax.experimental.pallas import tpu as pltpu

NEG_SLOPE = 0.01      # nn.LeakyReLU() default negative_slope
BN_EPS = 1e-5         # nn.BatchNorm1d default eps


def _leaky(v):
    return jnp.where(v >= 0, v, NEG_SLOPE * v)


# --------------------------------- kernel -----------------------------------

def _encoder4_kernel(x_ref, w1_ref, w2_ref, vec_ref, o_ref):
    # x_ref: (Bc, 58) batch chunk.  w1: (58, 32), w2: (32, 8) (BN1 folded in).
    # vec_ref: (4, 32) f32 slab -> row0=b1, row1=b2', row2=s2, row3=t2.
    x = x_ref[...]
    vec = vec_ref[...]
    b1 = vec[0:1, :]        # (1, 32)
    b2 = vec[1:2, :8]       # (1, 8)  fc2 bias with BN1 shift folded in
    s2 = vec[2:3, :8]       # (1, 8)  BN2 scale
    t2 = vec[3:4, :8]       # (1, 8)  BN2 shift

    # fc1 + LeakyReLU (Dropout == identity in eval). BN1 affine is folded
    # into w2/b2 by the wrapper (exact: the fold is post-activation).
    h = jnp.dot(x, w1_ref[...], preferred_element_type=jnp.float32) + b1
    h = _leaky(h)

    # fc2 (with BN1 folded) + LeakyReLU + BN2 affine.
    h = jnp.dot(h.astype(w2_ref.dtype), w2_ref[...],
                preferred_element_type=jnp.float32) + b2
    h = _leaky(h)
    o_ref[...] = h * s2 + t2


# -------------------------------- wrapper ------------------------------------

def _round_up(x, m):
    return ((x + m - 1) // m) * m


def _pick_block_b(B, cap=4096):
    """Batch-chunk size: multiple of 8, <= cap, and >=2 chunks when B allows
    so v7x's two TensorCores both get work (harmless on v5e/v6e)."""
    if B <= 8:
        return B
    n_chunks = max(2, pl.cdiv(B, cap))
    return min(_round_up(pl.cdiv(B, n_chunks), 8), B)


def encoder4_forward(x, kparams, *, block_b=None, cast_to_bf16=False):
    w1, w2, vec = kparams
    B, f_in = x.shape
    f_hid = w1.shape[-1]
    f_out = w2.shape[-1]

    if block_b is None:
        block_b = _pick_block_b(B)
    grid = (pl.cdiv(B, block_b),)

    if cast_to_bf16:
        # Halves the dominant HBM stream (x).  Dots still accumulate in f32
        # and the epilogue (bias / LeakyReLU / BN affine) stays in f32.
        x = x.astype(jnp.bfloat16)
        w1 = w1.astype(jnp.bfloat16)
        w2 = w2.astype(jnp.bfloat16)

    flops = 2 * B * (f_in * f_hid + f_hid * f_out)
    bytes_accessed = (x.size * x.dtype.itemsize
                      + w1.size * w1.dtype.itemsize
                      + w2.size * w2.dtype.itemsize
                      + vec.size * vec.dtype.itemsize
                      + B * f_out * 4)

    return pl.pallas_call(
        _encoder4_kernel,
        out_shape=jax.ShapeDtypeStruct((B, f_out), jnp.float32),
        grid=grid,
        in_specs=[
            pl.BlockSpec((block_b, f_in), lambda i: (i, 0)),   # batch chunk
            pl.BlockSpec(w1.shape, lambda i: (0, 0)),          # full W1
            pl.BlockSpec(w2.shape, lambda i: (0, 0)),          # full W2'
            pl.BlockSpec(vec.shape, lambda i: (0, 0)),         # packed vectors
        ],
        out_specs=pl.BlockSpec((block_b, f_out), lambda i: (i, 0)),
        compiler_params=pltpu.CompilerParams(
            dimension_semantics=("parallel",),          # shard chunks over TCs (v7x)
            vmem_limit_bytes=32 * 1024 * 1024,          # covers v5e's 16 MiB default
        ),
        cost_estimate=pl.CostEstimate(
            flops=flops, transcendentals=0, bytes_accessed=bytes_accessed),
    )(x, w1, w2, vec)


# ----------------------- parameters (PyTorch layouts) ------------------------

def init_params(key):
    def u(k, shape, fan_in):
        bound = 1.0 / jnp.sqrt(jnp.float32(fan_in))
        return jax.random.uniform(k, shape, jnp.float32, -bound, bound)

    ks = jax.random.split(key, 12)
    p = {}
    # Linear layers (PyTorch (out, in) layout).
    p['w_fc1'] = u(ks[0], (32, 58), 58)
    p['b_fc1'] = u(ks[1], (32,), 58)
    p['w_fc2'] = u(ks[2], (8, 32), 32)
    p['b_fc2'] = u(ks[3], (8,), 32)
    # BatchNorm1d affine params + running stats (randomized to exercise the path).
    p['bn1_gamma'] = jax.random.uniform(ks[4], (32,), jnp.float32, 0.5, 1.5)
    p['bn1_beta'] = 0.1 * jax.random.normal(ks[5], (32,), jnp.float32)
    p['bn1_mean'] = 0.1 * jax.random.normal(ks[6], (32,), jnp.float32)
    p['bn1_var'] = jax.random.uniform(ks[7], (32,), jnp.float32, 0.5, 1.5)
    p['bn2_gamma'] = jax.random.uniform(ks[8], (8,), jnp.float32, 0.5, 1.5)
    p['bn2_beta'] = 0.1 * jax.random.normal(ks[9], (8,), jnp.float32)
    p['bn2_mean'] = 0.1 * jax.random.normal(ks[10], (8,), jnp.float32)
    p['bn2_var'] = jax.random.uniform(ks[11], (8,), jnp.float32, 0.5, 1.5)
    return p


def to_kernel_params(p):
    """Matmul-layout weights; BN stats folded to affines; BN1 folded into fc2;
    remaining per-feature vectors packed into a single (4, 32) slab."""
    s1 = p['bn1_gamma'] / jnp.sqrt(p['bn1_var'] + BN_EPS)
    t1 = p['bn1_beta'] - p['bn1_mean'] * s1
    s2 = p['bn2_gamma'] / jnp.sqrt(p['bn2_var'] + BN_EPS)
    t2 = p['bn2_beta'] - p['bn2_mean'] * s2

    w1 = p['w_fc1'].T                      # (58, 32)
    w2_raw = p['w_fc2'].T                  # (32, 8)
    # Fold BN1 affine (applied after LeakyReLU, so the fold is exact):
    #   (h*s1 + t1) @ W2 + b2 == h @ (s1[:,None]*W2) + (t1 @ W2 + b2)
    w2 = s1[:, None] * w2_raw              # (32, 8)
    b2 = t1 @ w2_raw + p['b_fc2']          # (8,)

    vec = jnp.zeros((4, 32), jnp.float32)
    vec = vec.at[0, :].set(p['b_fc1'])     # b1
    vec = vec.at[1, :8].set(b2)            # b2' (fc2 bias + BN1 shift)
    vec = vec.at[2, :8].set(s2)            # BN2 scale
    vec = vec.at[3, :8].set(t2)            # BN2 shift
    return [w1, w2, vec]


# ------------------------- plain-JAX reference (XLA) --------------------------

def ref_forward(x, p):
    hp = jax.lax.Precision.HIGHEST
    lk = lambda v: jnp.where(v >= 0, v, NEG_SLOPE * v)
    h = lk(jnp.dot(x, p['w_fc1'].T, precision=hp) + p['b_fc1'])
    h = (h - p['bn1_mean']) / jnp.sqrt(p['bn1_var'] + BN_EPS) \
        * p['bn1_gamma'] + p['bn1_beta']
    h = lk(jnp.dot(h, p['w_fc2'].T, precision=hp) + p['b_fc2'])
    h = (h - p['bn2_mean']) / jnp.sqrt(p['bn2_var'] + BN_EPS) \
        * p['bn2_gamma'] + p['bn2_beta']
    return h


if __name__ == "__main__":
    B = 64                     # small batch; 58 input features fixed by the module
    key = jax.random.PRNGKey(0)
    kx, kp = jax.random.split(key)
    x = jax.random.normal(kx, (B, 58), jnp.float32)

    params = init_params(kp)
    kparams = to_kernel_params(params)
    ref = ref_forward(x, params)

    # f32-input path (default). Kernel dots use default precision vs the
    # HIGHEST-precision reference, so a loose tolerance is expected.
    out = jax.block_until_ready(encoder4_forward(x, kparams))
    assert out.shape == (B, 8)
    if not jnp.allclose(out, ref, atol=2e-2, rtol=2e-2):
        raise AssertionError(f"f32 kernel/reference mismatch:\n{out}\nvs\n{ref}")

    # bf16-input path (HBM-byte optimization); f32 accumulation + epilogue.
    out_bf16 = jax.block_until_ready(encoder4_forward(x, kparams, cast_to_bf16=True))
    assert out_bf16.shape == (B, 8)
    if not jnp.allclose(out_bf16, ref, atol=5e-2, rtol=5e-2):
        raise AssertionError(f"bf16 kernel/reference mismatch:\n{out_bf16}\nvs\n{ref}")

    print("KERNEL_OK")
</pallas_src>

<mosaic_0001>
module attributes {stable_mosaic.version = 11 : i64} {
  func.func @_encoder4_kernel(%arg0: i32, %arg1: memref<32x58xf32, #tpu.memory_space<vmem>>, %arg2: memref<58x32xf32, #tpu.memory_space<vmem>>, %arg3: memref<32x8xf32, #tpu.memory_space<vmem>>, %arg4: memref<4x32xf32, #tpu.memory_space<vmem>>, %arg5: memref<32x8xf32, #tpu.memory_space<vmem>>) attributes {dimension_semantics = [#tpu.dimension_semantics<parallel>], iteration_bounds = array<i64: 2>, scalar_prefetch = 0 : i64, scratch_operands = 0 : i64, tpu.core_type = #tpu.core_type<tc>, window_params = [{transform_indices = @transform_0, window_bounds = array<i64: 32, 58>}, {pipeline_mode = #tpu.pipeline_mode<synchronous>, transform_indices = @transform_1, window_bounds = array<i64: 58, 32>}, {pipeline_mode = #tpu.pipeline_mode<synchronous>, transform_indices = @transform_2, window_bounds = array<i64: 32, 8>}, {pipeline_mode = #tpu.pipeline_mode<synchronous>, transform_indices = @transform_3, window_bounds = array<i64: 4, 32>}, {transform_indices = @transform_4, window_bounds = array<i64: 32, 8>}]} {
    %c0 = arith.constant 0 : index
    %c0_0 = arith.constant 0 : index
    %0 = vector.load %arg1[%c0, %c0_0] : memref<32x58xf32, #tpu.memory_space<vmem>>, vector<32x58xf32>
    %c0_1 = arith.constant 0 : index
    %c0_2 = arith.constant 0 : index
    %1 = vector.load %arg4[%c0_1, %c0_2] : memref<4x32xf32, #tpu.memory_space<vmem>>, vector<4x32xf32>
    %2 = vector.extract_strided_slice %1 {offsets = [0, 0], sizes = [1, 32], strides = [1, 1]} : vector<4x32xf32> to vector<1x32xf32>
    %3 = vector.extract_strided_slice %1 {offsets = [1, 0], sizes = [1, 8], strides = [1, 1]} : vector<4x32xf32> to vector<1x8xf32>
    %4 = vector.extract_strided_slice %1 {offsets = [2, 0], sizes = [1, 8], strides = [1, 1]} : vector<4x32xf32> to vector<1x8xf32>
    %5 = vector.extract_strided_slice %1 {offsets = [3, 0], sizes = [1, 8], strides = [1, 1]} : vector<4x32xf32> to vector<1x8xf32>
    %c0_3 = arith.constant 0 : index
    %c0_4 = arith.constant 0 : index
    %6 = vector.load %arg2[%c0_3, %c0_4] : memref<58x32xf32, #tpu.memory_space<vmem>>, vector<58x32xf32>
    %cst = arith.constant dense<0.000000e+00> : vector<32x32xf32>
    %7 = tpu.matmul %0, %6, %cst {dimension_numbers = #tpu.dot_dimension_numbers<[1], [0], [0], [1], [0, 0, 1, 1], [], []>} : vector<32x58xf32>, vector<58x32xf32>, vector<32x32xf32> -> vector<32x32xf32>
    %8 = vector.broadcast %2 : vector<1x32xf32> to vector<32x32xf32>
    %9 = arith.addf %7, %8 : vector<32x32xf32>
    %cst_5 = arith.constant 0.000000e+00 : f32
    %10 = vector.broadcast %cst_5 : f32 to vector<32x32xf32>
    %11 = arith.cmpf oge, %9, %10 : vector<32x32xf32>
    %cst_6 = arith.constant 0.00999999977 : f32
    %12 = vector.broadcast %cst_6 : f32 to vector<32x32xf32>
    %13 = arith.mulf %12, %9 : vector<32x32xf32>
    %14 = arith.select %11, %9, %13 : vector<32x32xi1>, vector<32x32xf32>
    %c0_7 = arith.constant 0 : index
    %c0_8 = arith.constant 0 : index
    %15 = vector.load %arg3[%c0_7, %c0_8] : memref<32x8xf32, #tpu.memory_space<vmem>>, vector<32x8xf32>
    %cst_9 = arith.constant dense<0.000000e+00> : vector<32x8xf32>
    %16 = tpu.matmul %14, %15, %cst_9 {dimension_numbers = #tpu.dot_dimension_numbers<[1], [0], [0], [1], [0, 0, 1, 1], [], []>} : vector<32x32xf32>, vector<32x8xf32>, vector<32x8xf32> -> vector<32x8xf32>
    %17 = vector.broadcast %3 : vector<1x8xf32> to vector<32x8xf32>
    %18 = arith.addf %16, %17 : vector<32x8xf32>
    %cst_10 = arith.constant 0.000000e+00 : f32
    %19 = vector.broadcast %cst_10 : f32 to vector<32x8xf32>
    %20 = arith.cmpf oge, %18, %19 : vector<32x8xf32>
    %cst_11 = arith.constant 0.00999999977 : f32
    %21 = vector.broadcast %cst_11 : f32 to vector<32x8xf32>
    %22 = arith.mulf %21, %18 : vector<32x8xf32>
    %23 = arith.select %20, %18, %22 : vector<32x8xi1>, vector<32x8xf32>
    %24 = vector.broadcast %4 : vector<1x8xf32> to vector<32x8xf32>
    %25 = arith.mulf %23, %24 : vector<32x8xf32>
    %26 = vector.broadcast %5 : vector<1x8xf32> to vector<32x8xf32>
    %27 = arith.addf %25, %26 : vector<32x8xf32>
    %c0_12 = arith.constant 0 : index
    %c0_13 = arith.constant 0 : index
    %28 = vector.load %arg5[%c0_12, %c0_13] : memref<32x8xf32, #tpu.memory_space<vmem>>, vector<32x8xf32>
    tpu.vector_store %arg5[%c0_12, %c0_13], %27 {strides = array<i32>} : memref<32x8xf32, #tpu.memory_space<vmem>>, vector<32x8xf32>,
    return
  }
  func.func @transform_0(%arg0: i32) -> (i32, i32) {
    %c0_i32 = arith.constant 0 : i32
    %c0_i32_0 = arith.constant 0 : i32
    return %arg0, %c0_i32 : i32, i32
  }
  func.func @transform_1(%arg0: i32) -> (i32, i32) {
    %c0_i32 = arith.constant 0 : i32
    %c0_i32_0 = arith.constant 0 : i32
    %c0_i32_1 = arith.constant 0 : i32
    return %c0_i32, %c0_i32_0 : i32, i32
  }
  func.func @transform_2(%arg0: i32) -> (i32, i32) {
    %c0_i32 = arith.constant 0 : i32
    %c0_i32_0 = arith.constant 0 : i32
    %c0_i32_1 = arith.constant 0 : i32
    return %c0_i32, %c0_i32_0 : i32, i32
  }
  func.func @transform_3(%arg0: i32) -> (i32, i32) {
    %c0_i32 = arith.constant 0 : i32
    %c0_i32_0 = arith.constant 0 : i32
    %c0_i32_1 = arith.constant 0 : i32
    return %c0_i32, %c0_i32_0 : i32, i32
  }
  func.func @transform_4(%arg0: i32) -> (i32, i32) {
    %c0_i32 = arith.constant 0 : i32
    %c0_i32_0 = arith.constant 0 : i32
    return %arg0, %c0_i32 : i32, i32
  }
}

</mosaic_0001>

<bundles_post_ra>
// kernel: tpu_custom_call.1
= control target key start
LH: loop header
LB: loop body
LE: loop exit
PB: predicated region body
PF: predicated region fallthrough
CT: control target
= control target key end

     0   :  { %s672_s15 = smov 0   ;;  %s739_s0 = inlined_call_operand.vmem [shape: f32[64,58], index: 0, kind: input, shape index: {}]   ;;  %s740_s1 = inlined_call_operand.vmem [shape: f32[58,32], index: 1, kind: input, shape index: {}]   ;;  %s741_s2 = inlined_call_operand.vmem [shape: f32[32,8], index: 2, kind: input, shape index: {}]   ;;  %s742_s3 = inlined_call_operand.vmem [shape: f32[4,32], index: 3, kind: input, shape index: {}]   ;;  %s743_s4 = inlined_call_operand.vmem [shape: f32[64,8], index: 4, kind: output, shape index: {}]  }
   0x1 LB: > { %s527_s16 = sadd.s32 4294967295, %s644_s15   ;;  %p531_p0 = scmp.ge.s32.totalorder %s644_s15, 1  ;;  %s644_s15 = sphi %s672_s15, %s14_s15  }
   0x2   : > { %p163_p1 = scmp.lt.s32.totalorder %s644_s15, 3 }
   0x4   : > { %p164_p2 = pnand %p531_p0, %p163_p1 }
   0x5   : > { %v206_v0 = vld [vmem:[%s740_s1] sm:$0xff] (!%p164_p2)  ;;  %v207_v1 = vld [vmem:[%s740_s1 + $0x8] sm:$0xff] (!%p164_p2)  ;;  %v208_v2 = vld [vmem:[%s740_s1 + $0x10] sm:$0xff] (!%p164_p2)  ;;  %s532_s23 = sshll.u32 (!%p164_p2), %s527_s16, 2  ;;  %vm218_vm0 = vcmask (!%p164_p2), 474112   ;;  %vm231_vm1 = vcmask (!%p164_p2), 1041408   ;;  %v214_v22 = vlaneseq (!%p164_p2) }
   0x6   : > { %167 = sbr.rel (%p164_p2) target bundleno = 470 (0x1d6), region = 36  ;;  %v603_v3 = vpack.c.bf16 (!%p164_p2), %v207_v1, %v206_v0  ;;  %v209_v4 = vld [vmem:[%s740_s1 + $0x18] sm:$0xff] (!%p164_p2)  ;;  %p190_p3 = scmp.lt.s32.totalorder (!%p164_p2), %s532_s23, 7  ;;  %v210_v6 = vld [vmem:[%s740_s1 + $0x20] sm:$0xff] (!%p164_p2)  ;;  %v211_v7 = vld [vmem:[%s740_s1 + $0x28] sm:$0xff] (!%p164_p2)  ;;  %vm646_vm2 = vmmov (!%p164_p2), 1  }
   0x7   : > { %v607_v5 = vpack.c.bf16 (!%p164_p2), %v209_v4, %v208_v2  ;;  %v611_v8 = vpack.c.bf16 (!%p164_p2), %v211_v7, %v210_v6  ;;  %v212_v9 = vld [vmem:[%s740_s1 + $0x30] sm:$0xff] (!%p164_p2)  ;;  %v213_v10 = vld [vmem:[%s740_s1 + $0x38] sm:$0x3] (!%p164_p2)  ;;  %vm616_vm3 = vmpackc.low (!%p164_p2), %vm231_vm1, %vm646_vm2  ;;  %v215_v23 = vshrl.u32 (!%p164_p2), %v214_v22, 7  ;;  %vm340_vm6 = vcmask (!%p164_p2), 261120  }
   0x8   : > { %604 = vmatprep.subr.bf16.mxu0 (!%p164_p2), %v603_v3  ;;  %v615_v12 = vpack.c.bf16 (!%p164_p2), %v213_v10, %v212_v9  ;;  %v332_v16 = vld [vmem:[%s741_s2] sm:$0xff] (!%p164_p2)  ;;  %v333_v17 = vld [vmem:[%s741_s2 + $0x8] sm:$0xff] (!%p164_p2)  ;;  %v334_v19 = vld [vmem:[%s741_s2 + $0x10] sm:$0xff] (!%p164_p2)  ;;  %vm466_vm12 = vcmask (!%p164_p2), 64512  }
   0x9   : > { %606 = vmatpush3.bf16.msra.mxu0 (!%p164_p2), %v603_v3  ;;  %v621_v18 = vpack.c.bf16 (!%p164_p2), %v333_v17, %v332_v16  ;;  %v335_v20 = vld [vmem:[%s741_s2 + $0x18] sm:$0xff] (!%p164_p2)  ;;  %v216_v24 = vsub.s32 (!%p164_p2), 0, %v215_v23  ;;  %v205_v25 = vld [vmem:[%s742_s3] sm:$0xf] (!%p164_p2)  ;;  %v338_v43 = vsub.s32 (!%p164_p2), 1, %v215_v23  ;;  %v452_v45 = vsub.s32 (!%p164_p2), 2, %v215_v23 }
   0xa   : > { %608 = vmatprep.subr.bf16.mxu0 (!%p164_p2), %v607_v5  ;;  %v625_v21 = vpack.c.bf16 (!%p164_p2), %v335_v20, %v334_v19  ;;  %v460_v48 = vsub.s32 (!%p164_p2), 3, %v215_v23 }
   0xb   : > { %622 = vmatprep.subr.bf16.mxu1 (!%p164_p2), %v621_v18  ;;  %v217_v26 = vrot.slane (!%p164_p2), %v205_v25, %v216_v24  ;;  %v339_v44 = vrot.slane (!%p164_p2), %v205_v25, %v338_v43  ;;  %v453_v50 = vrot.slane (!%p164_p2), %v205_v25, %v452_v45 }
   0xc   : > { %624 = vmatpush3.bf16.msra.mxu1 (!%p164_p2), %v621_v18  ;;  %v461_v56 = vrot.slane (!%p164_p2), %v205_v25, %v460_v48 }
   0xd   : > { %s745_s23 = smov (!%p190_p3, %s532_s23), 7  ;;  %610 = vmatpush3.bf16.msra.mxu0 %v607_v5  ;;  %626 = vmatprep.subr.bf16.mxu1 %v625_v21 }
   0xe   : > { %s533_s30 = sshll.u32 %s745_s23, 3  ;;  %612 = vmatprep.subr.bf16.mxu0 %v611_v8 }
   0xf   : > { %s193_s11 = scalar_lea.vmem %s739_s0, %s533_s30  ;;  %s199_s26 = scalar_lea.vmem %s743_s4, %s533_s30 }
  0x10   : > { %v201_v11 = vld [vmem:[%s193_s11] sm:$0xff]  ;;  %v202_v13 = vld [vmem:[%s193_s11 + $0x8] sm:$0xff]  ;;  %v203_v14 = vld [vmem:[%s193_s11 + $0x10] sm:$0xff]  ;;  %628 = vmatpush3.bf16.msra.mxu1 %v625_v21 }
  0x11   : > { %583 = vmatprep.mubr.msk.f32.mxu0 %vm218_vm0, %v201_v11  ;;  %614 = vmatpush3.bf16.msra.mxu0 %v611_v8  ;;  %v204_v15 = vld [vmem:[%s193_s11 + $0x18] sm:$0xff] }
  0x12   : > { %617 = vmatprep.subr.msk.bf16.mxu0 %vm616_vm3, %v615_v12 }
  0x15   : > { %620 = vmatpush3.bf16.msk.msra.mxu0 %vm616_vm3, %v615_v12 }
  0x18   : > { %584 = vmatmul.mubr.msk.f32.vlgmr.msra.gmra.mrb[0].mxu0 %vm218_vm0, %v202_v13 }
  0x19   : > { %586 = vmatprep.mubr.msk.f32.mxu0 %vm218_vm0, %v203_v14 }
  0x1c   : > { %587 = vmatmul.mubr.msk.f32.gmra.mrb[2].mxu0 %vm218_vm0, %v204_v15 }
  0xeb   : > { %v585_v27 = vpop.f32.mrb[0].mxu0 }
  0xec   : > { %v307_v28 = vadd.f32 %v585_v27, %v217_v26  ;;  %v301_v29 = vpop.f32.mrb[1].mxu0 }
  0xed   : > { %v302_v30 = vadd.f32 %v301_v29, %v217_v26 }
  0xee   : > { %v325_v31 = vmul.f32 0.01, %v307_v28  ;;  %vm321_vm4 = vcmp.ge.f32.partialorder %v307_v28, 0.0 }
  0xef   : > { %v588_v32 = vpop.f32.mrb[2].mxu0  ;;  %vm320_vm5 = vcmp.ge.f32.partialorder %v302_v30, 0.0  ;;  %v324_v33 = vmul.f32 0.01, %v302_v30 }
  0xf0   : > { %v317_v34 = vadd.f32 %v588_v32, %v217_v26  ;;  %v311_v35 = vpop.f32.mrb[3].mxu0  ;;  %v329_v39 = vsel %vm321_vm4, %v307_v28, %v325_v31 }
  0xf1   : > { %v312_v36 = vadd.f32 %v311_v35, %v217_v26  ;;  %v328_v37 = vsel %vm320_vm5, %v302_v30, %v324_v33 }
  0xf2   : > { %v327_v38 = vmul.f32 0.01, %v317_v34  ;;  %597 = vmatprep.mubr.msk.f32.mxu1 %vm340_vm6, %v328_v37  ;;  %vm323_vm7 = vcmp.ge.f32.partialorder %v317_v34, 0.0 }
  0xf3   : > { %vm322_vm8 = vcmp.ge.f32.partialorder %v312_v36, 0.0  ;;  %v326_v40 = vmul.f32 0.01, %v312_v36  ;;  %598 = vmatmul.mubr.msk.f32.vlgmr.msra.gmra.mrb[0].mxu1 %vm340_vm6, %v329_v39 }
  0xf4   : > { %v331_v42 = vsel %vm323_vm7, %v317_v34, %v327_v38 }
  0xf5   : > { %v330_v41 = vsel %vm322_vm8, %v312_v36, %v326_v40 }
  0xf6   : > { %600 = vmatprep.mubr.msk.f32.mxu1 %vm340_vm6, %v330_v41 }
  0xf7   : > { %601 = vmatmul.mubr.msk.f32.gmra.mrb[2].mxu1 %vm340_vm6, %v331_v42 }
 0x1c6   : > { %v599_v46 = vpop.f32.mrb[0].mxu1 }
 0x1c7   : > { %v425_v47 = vadd.f32 %v599_v46, %v339_v44  ;;  %v419_v49 = vpop.f32.mrb[1].mxu1 }
 0x1c8   : > { %v420_v51 = vadd.f32 %v419_v49, %v339_v44 }
 0x1c9   : > { %vm439_vm9 = vcmp.ge.f32.partialorder %v425_v47, 0.0  ;;  %v443_v52 = vmul.f32 0.01, %v425_v47 }
 0x1ca   : > { %vm438_vm10 = vcmp.ge.f32.partialorder %v420_v51, 0.0  ;;  %v442_v53 = vmul.f32 0.01, %v420_v51  ;;  %v602_v54 = vpop.f32.mrb[2].mxu1 }
 0x1cb   : > { %v447_v55 = vsel %vm439_vm9, %v425_v47, %v443_v52  ;;  %v435_v57 = vadd.f32 %v602_v54, %v339_v44  ;;  %v429_v58 = vpop.f32.mrb[3].mxu1 }
 0x1cc   : > { %v455_v59 = vmul.f32 %v453_v50, %v447_v55  ;;  %v446_v60 = vsel %vm438_vm10, %v420_v51, %v442_v53  ;;  %v430_v61 = vadd.f32 %v429_v58, %v339_v44 }
 0x1cd   : > { %v454_v62 = vmul.f32 %v453_v50, %v446_v60  ;;  %vm441_vm11 = vcmp.ge.f32.partialorder %v435_v57, 0.0  ;;  %v445_v63 = vmul.f32 0.01, %v435_v57 }
 0x1ce   : > { %vm440_vm13 = vcmp.ge.f32.partialorder %v430_v61, 0.0  ;;  %v444_v0 = vmul.f32 0.01, %v430_v61  ;;  %v463_v3 = vadd.f32 %v461_v56, %v455_v59 }
 0x1cf   : > { %v462_v1 = vadd.f32 %v461_v56, %v454_v62  ;;  %v449_v2 = vsel %vm441_vm11, %v435_v57, %v445_v63 }
 0x1d0   : > { %v457_v4 = vmul.f32 %v453_v50, %v449_v2  ;;  %v448_v5 = vsel %vm440_vm13, %v430_v61, %v444_v0  ;;  %468 = vst.msk [vmem:[%s199_s26 + $0x8] sm:$0xff] %vm466_vm12, %v463_v3 }
 0x1d1   : > { %467 = vst.msk [vmem:[%s199_s26] sm:$0xff] %vm466_vm12, %v462_v1  ;;  %v456_v6 = vmul.f32 %v453_v50, %v448_v5 }
 0x1d2   : > { %v465_v8 = vadd.f32 %v461_v56, %v457_v4 }
 0x1d3   : > { %v464_v7 = vadd.f32 %v461_v56, %v456_v6 }
 0x1d4   : > { %470 = vst.msk [vmem:[%s199_s26 + $0x18] sm:$0xff] %vm466_vm12, %v465_v8 }
 0x1d5   : > { %469 = vst.msk [vmem:[%s199_s26 + $0x10] sm:$0xff] %vm466_vm12, %v464_v7 }
 0x1d6 PF: > { %s14_s15 = sadd.s32 1, %s644_s15  }
 0x1d7   : > { %p11_p4 = scmp.ge.s32.totalorder %s14_s15, 4  }
 0x1d9   :  { %13 = sbr.rel (!%p11_p4) target bundleno = 1 (0x1), region = 66 }

</bundles_post_ra>
